<compile_context>
chip_gen: v7x
topology: tpu7x:2x2x1
jax: 0.10.0
libtpu: 0.0.40
codegen_flags: <defaults>
</compile_context>

<pallas_src>
import functools
import math

import jax
import jax.numpy as jnp
from jax.experimental import pallas as pl
from jax.experimental.pallas import tpu as pltpu


def _affine_noise_kernel(x_ref, scale_ref, bias_ref, o_ref, *, clip):
    # x_ref: (1, rt, L) tile; scale_ref / bias_ref: (1, 1, L) per-lane constants
    # broadcast across the sublane (row) axis.  Pure VPU elementwise FMA.
    x = x_ref[...].astype(jnp.float32)
    y = x * scale_ref[...] + bias_ref[...]
    if clip:
        y = jnp.clip(y, 0.0, 1.0)
    o_ref[...] = y.astype(o_ref.dtype)


def _choose_lane_layout(C, H, W, itemsize,
                        max_lanes=4096, target_tile_bytes=2 * 1024 * 1024):
    """Pick a lane-dense 2D view (R, L) of one image and a row-tile size."""
    total = C * H * W
    base = (W * 128) // math.gcd(W, 128)  # lcm(W, 128)
    if total % base == 0:
        L = base
        while L * 2 <= max_lanes and total % (L * 2) == 0:
            L *= 2
    else:
        # TODO(synk): fall back to W-wide lanes (masked stores) when no
        # 128-multiple lane width divides C*H*W.
        L = W
    R = total // L

    sub = 8 * max(1, 4 // itemsize)  # sublane granule: 8 (f32), 16 (bf16), ...
    rows_target = max(sub, target_tile_bytes // (L * itemsize))
    if R <= rows_target:
        rt = R                       # full second-to-last dim is always legal
    else:
        rt = None
        start = rows_target - (rows_target % sub)
        for cand in range(start, 0, -sub):
            if R % cand == 0:
                rt = cand
                break
        if rt is None:
            rt = R                   # rare: no aligned divisor; use full rows
    return L, R, rt


def _apply_affine_noise(img, scale, bias, clip):
    """out[n,c,h,w] = clip?(scale[n,w]*img[n,c,h,w] + bias[n,w])  via Pallas."""
    N, C, H, W = img.shape
    itemsize = jnp.dtype(img.dtype).itemsize
    L, R, rt = _choose_lane_layout(C, H, W, itemsize)

    # Contiguous (free) reshape: flat index within an image is ((c*H+h)*W + w),
    # so lane l of the (R, L) view maps to column w = l % W.  Per-column
    # constants therefore tile along the lane axis with period W.
    x3 = img.reshape(N, R, L)
    reps = L // W
    scale_l = jnp.tile(scale.astype(jnp.float32), (1, reps)).reshape(N, 1, L)
    bias_l = jnp.tile(bias.astype(jnp.float32), (1, reps)).reshape(N, 1, L)

    grid = (N, R // rt)
    kernel = functools.partial(_affine_noise_kernel, clip=clip)

    out3 = pl.pallas_call(
        kernel,
        out_shape=jax.ShapeDtypeStruct((N, R, L), img.dtype),
        grid_spec=pltpu.PrefetchScalarGridSpec(
            num_scalar_prefetch=0,
            grid=grid,
            in_specs=[
                pl.BlockSpec((1, rt, L), lambda n, r: (n, r, 0)),
                pl.BlockSpec((1, 1, L), lambda n, r: (n, 0, 0)),
                pl.BlockSpec((1, 1, L), lambda n, r: (n, 0, 0)),
            ],
            out_specs=pl.BlockSpec((1, rt, L), lambda n, r: (n, r, 0)),
        ),
        compiler_params=pltpu.CompilerParams(
            dimension_semantics=("parallel", "parallel"),
        ),
        input_output_aliases={0: 0},
    )(x3, scale_l, bias_l)

    return out3.reshape(N, C, H, W)


def _sample_affine_params(key, case, noiseIntL, N, W):
    """Sample per-(batch, column) noise and fold it into (scale, bias, clip)."""
    lo, hi = float(noiseIntL[0]), float(noiseIntL[1])
    ks = jax.random.split(key, 8)

    def _beta(k):
        return jax.random.uniform(k, (N, 1), dtype=jnp.float32,
                                  minval=lo, maxval=hi)

    def _col(k, beta):
        return jax.random.normal(k, (N, W), dtype=jnp.float32) * beta

    if case == 0:
        A1 = _col(ks[4], _beta(ks[0]))
        return jnp.ones((N, W), jnp.float32), A1, True
    if case == 1:
        A1 = _col(ks[4], _beta(ks[0]))
        A2 = _col(ks[5], _beta(ks[1]))
        return 1.0 + A2, A1, True
    if case == 2:
        A1 = _col(ks[4], _beta(ks[0]))
        A2 = _col(ks[5], _beta(ks[1]))
        A3 = _col(ks[6], _beta(ks[2]))
        return 1.0 + A2 + A3 * A3, A1, True
    if case in (3, 4):
        A1 = _col(ks[4], _beta(ks[0]))
        A2 = _col(ks[5], _beta(ks[1]))
        A3 = _col(ks[6], _beta(ks[2]))
        A4 = _col(ks[7], _beta(ks[3]))
        return 1.0 + A2 + A3 * A3 + A4 * A4 * A4, A1, (case == 3)
    raise ValueError(f"unsupported case {case}")


def add_noise_forward(img_train, case, noiseIntL, key):
    """Pallas equivalent of add_noise(case, noiseIntL).forward(img_train)."""
    N, _, _, W = img_train.shape
    scale, bias, clip = _sample_affine_params(key, case, noiseIntL, N, W)
    return _apply_affine_noise(img_train, scale, bias, clip)


def _reference(img, scale, bias, clip):
    y = (img.astype(jnp.float32) * scale[:, None, None, :]
         + bias[:, None, None, :])
    if clip:
        y = jnp.clip(y, 0.0, 1.0)
    return y.astype(img.dtype)


if __name__ == "__main__":
    key = jax.random.PRNGKey(0)
    k_img, k_noise, k_img2 = jax.random.split(key, 3)

    noiseIntL = (0.0, 0.2)
    img = jax.random.uniform(k_img, (2, 3, 16, 16), dtype=jnp.float32)

    # All five cases of the module, checked against a pure-JAX reference
    # built from the same sampled scale/bias.
    for case in range(5):
        out = add_noise_forward(img, case, noiseIntL, k_noise)
        out = jax.block_until_ready(out)

        scale, bias, clip = _sample_affine_params(
            k_noise, case, noiseIntL, img.shape[0], img.shape[3])
        ref = _reference(img, scale, bias, clip)

        assert out.shape == img.shape and out.dtype == img.dtype
        assert jnp.allclose(out, ref, atol=1e-5, rtol=1e-5), f"case {case} mismatch"

    # Exercise the fallback layout path (W not compatible with a 128-wide lane
    # reshape) on one case.
    img_odd = jax.random.uniform(k_img2, (2, 3, 16, 15), dtype=jnp.float32)
    out = jax.block_until_ready(add_noise_forward(img_odd, 2, noiseIntL, k_noise))
    scale, bias, clip = _sample_affine_params(k_noise, 2, noiseIntL, 2, 15)
    assert jnp.allclose(out, _reference(img_odd, scale, bias, clip),
                        atol=1e-5, rtol=1e-5)

    print("KERNEL_OK")
</pallas_src>

<mosaic_0001>
module attributes {stable_mosaic.version = 11 : i64} {
  func.func @_affine_noise_kernel(%arg0: i32, %arg1: i32, %arg2: memref<1x3x256xf32, #tpu.memory_space<vmem>>, %arg3: memref<1x1x256xf32, #tpu.memory_space<vmem>>, %arg4: memref<1x1x256xf32, #tpu.memory_space<vmem>>, %arg5: memref<1x3x256xf32, #tpu.memory_space<vmem>>) attributes {dimension_semantics = [#tpu.dimension_semantics<parallel>, #tpu.dimension_semantics<parallel>], iteration_bounds = array<i64: 2, 1>, scalar_prefetch = 0 : i64, scratch_operands = 0 : i64, tpu.core_type = #tpu.core_type<tc>, window_params = [{transform_indices = @transform_0, window_bounds = array<i64: 1, 3, 256>}, {transform_indices = @transform_1, window_bounds = array<i64: 1, 1, 256>}, {transform_indices = @transform_2, window_bounds = array<i64: 1, 1, 256>}, {transform_indices = @transform_3, window_bounds = array<i64: 1, 3, 256>}]} {
    %c0 = arith.constant 0 : index
    %c0_0 = arith.constant 0 : index
    %c0_1 = arith.constant 0 : index
    %0 = vector.load %arg2[%c0, %c0_0, %c0_1] : memref<1x3x256xf32, #tpu.memory_space<vmem>>, vector<1x3x256xf32>
    %c0_2 = arith.constant 0 : index
    %c0_3 = arith.constant 0 : index
    %c0_4 = arith.constant 0 : index
    %1 = vector.load %arg3[%c0_2, %c0_3, %c0_4] : memref<1x1x256xf32, #tpu.memory_space<vmem>>, vector<1x1x256xf32>
    %2 = vector.broadcast %1 : vector<1x1x256xf32> to vector<1x3x256xf32>
    %3 = arith.mulf %0, %2 : vector<1x3x256xf32>
    %c0_5 = arith.constant 0 : index
    %c0_6 = arith.constant 0 : index
    %c0_7 = arith.constant 0 : index
    %4 = vector.load %arg4[%c0_5, %c0_6, %c0_7] : memref<1x1x256xf32, #tpu.memory_space<vmem>>, vector<1x1x256xf32>
    %5 = vector.broadcast %4 : vector<1x1x256xf32> to vector<1x3x256xf32>
    %6 = arith.addf %3, %5 : vector<1x3x256xf32>
    %cst = arith.constant 0.000000e+00 : f32
    %cst_8 = arith.constant 1.000000e+00 : f32
    %7 = vector.broadcast %cst : f32 to vector<1x3x256xf32>
    %8 = arith.maximumf %7, %6 : vector<1x3x256xf32>
    %9 = vector.broadcast %cst_8 : f32 to vector<1x3x256xf32>
    %10 = arith.minimumf %9, %8 : vector<1x3x256xf32>
    %c0_9 = arith.constant 0 : index
    %c0_10 = arith.constant 0 : index
    %c0_11 = arith.constant 0 : index
    %11 = vector.load %arg5[%c0_9, %c0_10, %c0_11] : memref<1x3x256xf32, #tpu.memory_space<vmem>>, vector<1x3x256xf32>
    tpu.vector_store %arg5[%c0_9, %c0_10, %c0_11], %10 {strides = array<i32>} : memref<1x3x256xf32, #tpu.memory_space<vmem>>, vector<1x3x256xf32>,
    return
  }
  func.func @transform_0(%arg0: i32, %arg1: i32) -> (i32, i32, i32) {
    %c0_i32 = arith.constant 0 : i32
    %c0_i32_0 = arith.constant 0 : i32
    return %arg0, %arg1, %c0_i32 : i32, i32, i32
  }
  func.func @transform_1(%arg0: i32, %arg1: i32) -> (i32, i32, i32) {
    %c0_i32 = arith.constant 0 : i32
    %c0_i32_0 = arith.constant 0 : i32
    %c0_i32_1 = arith.constant 0 : i32
    return %arg0, %c0_i32, %c0_i32_0 : i32, i32, i32
  }
  func.func @transform_2(%arg0: i32, %arg1: i32) -> (i32, i32, i32) {
    %c0_i32 = arith.constant 0 : i32
    %c0_i32_0 = arith.constant 0 : i32
    %c0_i32_1 = arith.constant 0 : i32
    return %arg0, %c0_i32, %c0_i32_0 : i32, i32, i32
  }
  func.func @transform_3(%arg0: i32, %arg1: i32) -> (i32, i32, i32) {
    %c0_i32 = arith.constant 0 : i32
    %c0_i32_0 = arith.constant 0 : i32
    return %arg0, %arg1, %c0_i32 : i32, i32, i32
  }
}

</mosaic_0001>

<bundles_post_ra>
// kernel: tpu_custom_call.1
= control target key start
LH: loop header
LB: loop body
LE: loop exit
PB: predicated region body
PF: predicated region fallthrough
CT: control target
= control target key end

     0   :  { %s470_s12 = smov 0   ;;  %s472_s13 = smov 0   ;;  %s509_s0 = inlined_call_operand.vmem [shape: f32[2,3,256], index: 0, kind: input, shape index: {}, may-alias: {0,3}]   ;;  %s510_s1 = inlined_call_operand.vmem [shape: f32[2,1,256], index: 1, kind: input, shape index: {}]   ;;  %s511_s2 = inlined_call_operand.vmem [shape: f32[2,1,256], index: 2, kind: input, shape index: {}]   ;;  %s512_s3 = inlined_call_operand.vmem [shape: f32[2,3,256], index: 3, kind: output, shape index: {}, may-alias: {0,3}]  }
   0x1   :  { %s474_s14 = smov 0  }
   0x2 LB: > { %s25_s15 = sadd.s32 1, %s444_s13  ;;  %p391_p0 = scmp.ge.s32.totalorder %s448_s14, 1  ;;  %s448_s14 = sphi %s474_s14, %s13_s14   ;;  %s444_s13 = sphi %s472_s13, %s514_s13   ;;  %s440_s12 = sphi %s470_s12, %s513_s12  }
   0x3   : > { %p27_p1 = scmp.ge.s32.totalorder %s25_s15, 2  ;;  %p175_p2 = scmp.lt.s32.totalorder %s448_s14, 3 }
   0x5   : > { %s516_s15 = smov (%p27_p1, %s25_s15), 0  ;;  %p176_p3 = pnand %p391_p0, %p175_p2 }
   0x6   : > { %p215_p4 = scmp.lt.s32.totalorder (!%p176_p3), %s440_s12, 1  ;;  %v244_v0 = vlaneseq (!%p176_p3) }
   0x7   : > { %179 = sbr.rel (%p176_p3) target bundleno = 31 (0x1f), region = 32 }
   0x8   : > { %v245_v1 = vshrl.u32 (!%p176_p3), %v244_v0, 7 }
   0xa   : > { %v246_v2 = vsub.s32 (!%p176_p3), 0, %v245_v1  ;;  %v250_v3 = vsub.s32 (!%p176_p3), 1, %v245_v1 }
   0xe   : > { %s518_s12 = smov (!%p215_p4, %s440_s12), 1 }
   0xf   : > { %s400_s16 = sshll.u32 %s518_s12, 3  ;;  %s394_s17 = sshll.u32 %s518_s12, 1 }
  0x10   : > { %s223_s20 = scalar_lea.vmem %s509_s0, %s400_s16  ;;  %s227_s23 = scalar_lea.vmem %s510_s1, %s394_s17 }
  0x11   : > { %s231_s26 = scalar_lea.vmem %s511_s2, %s394_s17  ;;  %v242_v4 = vld [vmem:[%s227_s23] sm:$0x3]  ;;  %s240_s29 = scalar_lea.vmem %s512_s3, %s400_s16 }
  0x12   : > { %v247_v5 = vrot.slane %v242_v4, %v246_v2  ;;  %v251_v6 = vrot.slane %v242_v4, %v250_v3  ;;  %v255_v7 = vld [vmem:[%s231_s26] sm:$0x3] }
  0x13   : > { %v241_v8 = vld [vmem:[%s223_s20] sm:$0x77]  ;;  %v260_v9 = vrot.slane %v255_v7, %v246_v2  ;;  %v264_v10 = vrot.slane %v255_v7, %v250_v3 }
  0x14   : > { %v252_v11 = vcombine.low %v247_v5, %v251_v6 }
  0x15   : > { %v265_v12 = vcombine.low %v260_v9, %v264_v10 }
  0x16   : > { %v254_v13 = vmul.f32 %v252_v11, %v241_v8 }
  0x18   : > { %v267_v14 = vadd.f32 %v265_v12, %v254_v13 }
  0x1a   : > { %v268_v15 = vmax.f32 %v267_v14, 0.0 }
  0x1c   : > { %v269_v16 = vmin.f32 %v268_v15, 1.0 }
  0x1e   : > { %270 = vst [vmem:[%s240_s29] sm:$0x77] %v269_v16 }
  0x1f PF: > { %s13_s14 = sadd.s32 1, %s448_s14   ;;  %s513_s12 = smov %s444_s13 }
  0x20   : > { %p10_p5 = scmp.ge.s32.totalorder %s13_s14, 4   ;;  %s514_s13 = smov %s516_s15 }
  0x22   :  { %12 = sbr.rel (!%p10_p5) target bundleno = 2 (0x2), region = 68 }

</bundles_post_ra>
